<compile_context>
chip_gen: v7x
topology: tpu7x:2x2x1
jax: 0.10.0
libtpu: 0.0.40
codegen_flags: <defaults>
</compile_context>

<pallas_src>
import functools

import jax
import jax.numpy as jnp
from jax import lax
from jax.experimental import pallas as pl
from jax.experimental.pallas import tpu as pltpu

NEG_SLOPE = 0.01  # nn.LeakyReLU default negative slope


def _cno_block_kernel(x_ref, w_ref, mask_ref, film_ref, o_ref, xcol_ref, *,
                      W, B, Cin_pad):
    # x_ref:    (B, Cin_pad, H*W)   f32, NCHW with flattened space
    # w_ref:    (Cout, 9*Cin_pad)   bf16, fused conv weight, tap-major / channel-minor
    # mask_ref: (8, H*W)            f32 boundary masks for the 8 non-center taps
    # film_ref: (B, 2, Cout, 1)     f32 [scale ; conv_bias*scale + film_bias]
    # o_ref:    (B, Cout, H*W)
    # xcol_ref: (9*Cin_pad, B*H*W)  bf16 im2col scratch
    HW = x_ref.shape[-1]
    masks = mask_ref[...]                              # (8, HW) f32, loaded once

    # --- im2col: masked XLU lane-rotates written per-tap into the bf16 scratch ---
    for b in range(B):
        xb = x_ref[b]                                  # (Cin_pad, HW) f32
        j = 0                                          # non-center tap counter
        t = 0
        for dy in (-1, 0, 1):
            for dx in (-1, 0, 1):
                d = dy * W + dx
                if d == 0:
                    tap = xb                           # center tap: no roll, no mask
                else:
                    # tap[c, p] = x[c, (p + d) mod HW]  (jnp.roll convention)
                    tap = pltpu.roll(xb, shift=(-d) % HW, axis=1)
                    tap = tap * masks[j:j + 1, :]      # f32 mask multiply (v5e-safe)
                    j += 1
                xcol_ref[pl.ds(t * Cin_pad, Cin_pad), pl.ds(b * HW, HW)] = (
                    tap.astype(jnp.bfloat16))
                t += 1

    # --- one fused MXU matmul over all taps and all batch elements ---
    acc = jnp.dot(w_ref[...], xcol_ref[...],
                  preferred_element_type=jnp.float32)  # (Cout, B*HW) f32

    # --- per-batch FiLM + LeakyReLU epilogue (f32), lane-dense stores ---
    for b in range(B):
        scale = film_ref[b, 0]                         # (Cout, 1)
        fbias = film_ref[b, 1]                         # (Cout, 1) conv bias pre-folded
        y = acc[:, b * HW:(b + 1) * HW] * scale + fbias
        y = jnp.where(y >= 0, y, NEG_SLOPE * y)
        o_ref[b] = y.astype(o_ref.dtype)


def cno_block_forward(x_nchw, t, params):
    """CNOBlock forward. x_nchw: (B, Cin, H, W) float32, t: (B,) timesteps."""
    B, Cin, H, W = x_nchw.shape
    HW = H * W
    Cout = params["conv_w"].shape[0]
    Cin_pad = ((Cin + 15) // 16) * 16     # bf16 sublane tile -> tile-aligned tap blocks

    # FiLM MLPs (tiny 1->128->Cout linears) + conv-bias folding; O(B*Cout) wrapper work.
    tcol = t.reshape(-1, 1).astype(x_nchw.dtype)                             # (B, 1)
    scale = (tcol @ params["w_s1"].T + params["b_s1"]) @ params["w_s2"].T + params["b_s2"]
    fbias = (tcol @ params["w_b1"].T + params["b_b1"]) @ params["w_b2"].T + params["b_b2"]
    fused_b = params["conv_b"][None, :] * scale + fbias                      # (B, Cout)
    film = jnp.stack([scale, fused_b], axis=1)[..., None]                    # (B, 2, Cout, 1)

    # Fused conv weight: (Cout, 9*Cin_pad), tap-major / channel-minor, bf16 for the MXU.
    w = params["conv_w"]                                                     # (Cout, Cin, 3, 3)
    if Cin_pad != Cin:
        w = jnp.pad(w, ((0, 0), (0, Cin_pad - Cin), (0, 0), (0, 0)))
    w2 = jnp.transpose(w, (0, 2, 3, 1)).reshape(Cout, 9 * Cin_pad).astype(jnp.bfloat16)

    # Input: native NCHW, spatially flattened (free reshape; no transpose, no spatial pad).
    x3 = x_nchw.reshape(B, Cin, HW)
    if Cin_pad != Cin:
        x3 = jnp.pad(x3, ((0, 0), (0, Cin_pad - Cin), (0, 0)))

    # Boundary masks for the 8 non-center taps, packed as one exactly tile-aligned
    # (8, HW) f32 block (no sublane padding waste, single small DMA).
    pos = jnp.arange(HW, dtype=jnp.int32)
    row, col = pos // W, pos % W
    mask_rows = []
    for dy in (-1, 0, 1):
        for dx in (-1, 0, 1):
            if dy == 0 and dx == 0:
                continue
            m = (row + dy >= 0) & (row + dy < H) & (col + dx >= 0) & (col + dx < W)
            mask_rows.append(m)
    mask8 = jnp.stack(mask_rows).astype(x_nchw.dtype)                        # (8, HW)

    out3 = pl.pallas_call(
        functools.partial(_cno_block_kernel, W=W, B=B, Cin_pad=Cin_pad),
        out_shape=jax.ShapeDtypeStruct((B, Cout, HW), x_nchw.dtype),
        grid_spec=pltpu.PrefetchScalarGridSpec(
            num_scalar_prefetch=0,
            grid=(1,),                                  # batch folded into one step
            in_specs=[
                pl.BlockSpec((B, Cin_pad, HW), lambda i: (0, 0, 0)),
                pl.BlockSpec((Cout, 9 * Cin_pad), lambda i: (0, 0)),
                pl.BlockSpec((8, HW), lambda i: (0, 0)),
                pl.BlockSpec((B, 2, Cout, 1), lambda i: (0, 0, 0, 0)),
            ],
            out_specs=pl.BlockSpec((B, Cout, HW), lambda i: (0, 0, 0)),
            scratch_shapes=[pltpu.VMEM((9 * Cin_pad, B * HW), jnp.bfloat16)],
        ),
        compiler_params=pltpu.CompilerParams(dimension_semantics=("arbitrary",)),
    )(x3, w2, mask8, film)

    return out3.reshape(B, Cout, H, W)                  # free reshape back to NCHW


if __name__ == "__main__":
    key = jax.random.PRNGKey(0)
    B, Cin, Cout, H, W = 2, 4, 4, 16, 16
    inter = 128  # FILM 'intermediate'
    ks = jax.random.split(key, 10)

    x = jax.random.normal(ks[0], (B, Cin, H, W), jnp.float32)
    t = jax.random.uniform(ks[1], (B,), jnp.float32)

    # NOTE: the PyTorch module zero-inits the FiLM MLP weights (making FiLM an identity
    # at init); deterministic small random values are used here so the FiLM path is
    # numerically exercised. Shapes match __init__.
    params = {
        "conv_w": 0.1 * jax.random.normal(ks[2], (Cout, Cin, 3, 3), jnp.float32),
        "conv_b": 0.1 * jax.random.normal(ks[3], (Cout,), jnp.float32),
        "w_s1": 0.1 * jax.random.normal(ks[4], (inter, 1), jnp.float32),    # inp2lat_sacale.weight
        "b_s1": 0.1 * jax.random.normal(ks[5], (inter,), jnp.float32),      # inp2lat_sacale.bias
        "w_s2": 0.1 * jax.random.normal(ks[6], (Cout, inter), jnp.float32), # lat2scale.weight
        "b_s2": jnp.ones((Cout,), jnp.float32),                             # lat2scale.bias (=1)
        "w_b1": 0.1 * jax.random.normal(ks[7], (inter, 1), jnp.float32),    # inp2lat_bias.weight
        "b_b1": 0.1 * jax.random.normal(ks[8], (inter,), jnp.float32),      # inp2lat_bias.bias
        "w_b2": 0.1 * jax.random.normal(ks[9], (Cout, inter), jnp.float32), # lat2bias.weight
        "b_b2": jnp.zeros((Cout,), jnp.float32),                            # lat2bias.bias (=0)
    }

    fwd = jax.jit(cno_block_forward)
    y = jax.block_until_ready(fwd(x, t, params))

    # Pure-JAX reference (NCHW, matches PyTorch semantics).
    y_ref = lax.conv_general_dilated(
        x, params["conv_w"], window_strides=(1, 1), padding="SAME",
        dimension_numbers=("NCHW", "OIHW", "NCHW"),
    ) + params["conv_b"][None, :, None, None]
    tcol = t.reshape(-1, 1)
    scale = (tcol @ params["w_s1"].T + params["b_s1"]) @ params["w_s2"].T + params["b_s2"]
    fbias = (tcol @ params["w_b1"].T + params["b_b1"]) @ params["w_b2"].T + params["b_b2"]
    y_ref = y_ref * scale[:, :, None, None] + fbias[:, :, None, None]
    y_ref = jnp.where(y_ref >= 0, y_ref, NEG_SLOPE * y_ref)

    assert y.shape == (B, Cout, H, W) and y.dtype == jnp.float32
    # Tolerance loosened vs. a pure-f32 version because the conv matmul runs on the
    # bf16 MXU path (f32 accumulate); observed error is O(1e-3) at these magnitudes.
    assert jnp.allclose(y, y_ref, atol=5e-2, rtol=5e-2), float(jnp.max(jnp.abs(y - y_ref)))
    print("KERNEL_OK")
</pallas_src>

<mosaic_0001>
module attributes {stable_mosaic.version = 11 : i64} {
  func.func @_cno_block_kernel(%arg0: i32, %arg1: memref<2x16x256xf32, #tpu.memory_space<vmem>>, %arg2: memref<4x144xbf16, #tpu.memory_space<vmem>>, %arg3: memref<8x256xf32, #tpu.memory_space<vmem>>, %arg4: memref<2x2x4x1xf32, #tpu.memory_space<vmem>>, %arg5: memref<2x4x256xf32, #tpu.memory_space<vmem>>, %arg6: memref<144x512xbf16, #tpu.memory_space<vmem>>) attributes {dimension_semantics = [#tpu.dimension_semantics<arbitrary>], iteration_bounds = array<i64: 1>, scalar_prefetch = 0 : i64, scratch_operands = 1 : i64, tpu.core_type = #tpu.core_type<tc>, window_params = [{pipeline_mode = #tpu.pipeline_mode<synchronous>, transform_indices = @transform_0, window_bounds = array<i64: 2, 16, 256>}, {pipeline_mode = #tpu.pipeline_mode<synchronous>, transform_indices = @transform_1, window_bounds = array<i64: 4, 144>}, {pipeline_mode = #tpu.pipeline_mode<synchronous>, transform_indices = @transform_2, window_bounds = array<i64: 8, 256>}, {pipeline_mode = #tpu.pipeline_mode<synchronous>, transform_indices = @transform_3, window_bounds = array<i64: 2, 2, 4, 1>}, {pipeline_mode = #tpu.pipeline_mode<synchronous>, transform_indices = @transform_4, window_bounds = array<i64: 2, 4, 256>}]} {
    %c0 = arith.constant 0 : index
    %c0_0 = arith.constant 0 : index
    %0 = vector.load %arg3[%c0, %c0_0] : memref<8x256xf32, #tpu.memory_space<vmem>>, vector<8x256xf32>
    %c0_1 = arith.constant 0 : index
    %c0_2 = arith.constant 0 : index
    %c0_3 = arith.constant 0 : index
    %1 = vector.load %arg1[%c0_1, %c0_2, %c0_3] : memref<2x16x256xf32, #tpu.memory_space<vmem>>, vector<1x16x256xf32>
    %2 = vector.shape_cast %1 : vector<1x16x256xf32> to vector<16x256xf32>
    %c17_i32 = arith.constant 17 : i32
    %3 = tpu.dynamic_rotate %2 by %c17_i32 dim 1 : vector<16x256xf32>, i32 -> vector<16x256xf32>
    %4 = vector.extract_strided_slice %0 {offsets = [0, 0], sizes = [1, 256], strides = [1, 1]} : vector<8x256xf32> to vector<1x256xf32>
    %5 = vector.broadcast %4 : vector<1x256xf32> to vector<16x256xf32>
    %6 = arith.mulf %3, %5 : vector<16x256xf32>
    %7 = arith.truncf %6 : vector<16x256xf32> to vector<16x256xbf16>
    %c0_4 = arith.constant 0 : index
    %c0_5 = arith.constant 0 : index
    %8 = vector.load %arg6[%c0_4, %c0_5] : memref<144x512xbf16, #tpu.memory_space<vmem>>, vector<16x256xbf16>
    tpu.vector_store %arg6[%c0_4, %c0_5], %7 {strides = array<i32>} : memref<144x512xbf16, #tpu.memory_space<vmem>>, vector<16x256xbf16>,
    %c16_i32 = arith.constant 16 : i32
    %9 = tpu.dynamic_rotate %2 by %c16_i32 dim 1 : vector<16x256xf32>, i32 -> vector<16x256xf32>
    %10 = vector.extract_strided_slice %0 {offsets = [1, 0], sizes = [1, 256], strides = [1, 1]} : vector<8x256xf32> to vector<1x256xf32>
    %11 = vector.broadcast %10 : vector<1x256xf32> to vector<16x256xf32>
    %12 = arith.mulf %9, %11 : vector<16x256xf32>
    %13 = arith.truncf %12 : vector<16x256xf32> to vector<16x256xbf16>
    %c16 = arith.constant 16 : index
    %c0_6 = arith.constant 0 : index
    %14 = vector.load %arg6[%c16, %c0_6] : memref<144x512xbf16, #tpu.memory_space<vmem>>, vector<16x256xbf16>
    tpu.vector_store %arg6[%c16, %c0_6], %13 {strides = array<i32>} : memref<144x512xbf16, #tpu.memory_space<vmem>>, vector<16x256xbf16>,
    %c15_i32 = arith.constant 15 : i32
    %15 = tpu.dynamic_rotate %2 by %c15_i32 dim 1 : vector<16x256xf32>, i32 -> vector<16x256xf32>
    %16 = vector.extract_strided_slice %0 {offsets = [2, 0], sizes = [1, 256], strides = [1, 1]} : vector<8x256xf32> to vector<1x256xf32>
    %17 = vector.broadcast %16 : vector<1x256xf32> to vector<16x256xf32>
    %18 = arith.mulf %15, %17 : vector<16x256xf32>
    %19 = arith.truncf %18 : vector<16x256xf32> to vector<16x256xbf16>
    %c32 = arith.constant 32 : index
    %c0_7 = arith.constant 0 : index
    %20 = vector.load %arg6[%c32, %c0_7] : memref<144x512xbf16, #tpu.memory_space<vmem>>, vector<16x256xbf16>
    tpu.vector_store %arg6[%c32, %c0_7], %19 {strides = array<i32>} : memref<144x512xbf16, #tpu.memory_space<vmem>>, vector<16x256xbf16>,
    %c1_i32 = arith.constant 1 : i32
    %21 = tpu.dynamic_rotate %2 by %c1_i32 dim 1 : vector<16x256xf32>, i32 -> vector<16x256xf32>
    %22 = vector.extract_strided_slice %0 {offsets = [3, 0], sizes = [1, 256], strides = [1, 1]} : vector<8x256xf32> to vector<1x256xf32>
    %23 = vector.broadcast %22 : vector<1x256xf32> to vector<16x256xf32>
    %24 = arith.mulf %21, %23 : vector<16x256xf32>
    %25 = arith.truncf %24 : vector<16x256xf32> to vector<16x256xbf16>
    %c48 = arith.constant 48 : index
    %c0_8 = arith.constant 0 : index
    %26 = vector.load %arg6[%c48, %c0_8] : memref<144x512xbf16, #tpu.memory_space<vmem>>, vector<16x256xbf16>
    tpu.vector_store %arg6[%c48, %c0_8], %25 {strides = array<i32>} : memref<144x512xbf16, #tpu.memory_space<vmem>>, vector<16x256xbf16>,
    %27 = arith.truncf %2 : vector<16x256xf32> to vector<16x256xbf16>
    %c64 = arith.constant 64 : index
    %c0_9 = arith.constant 0 : index
    %28 = vector.load %arg6[%c64, %c0_9] : memref<144x512xbf16, #tpu.memory_space<vmem>>, vector<16x256xbf16>
    tpu.vector_store %arg6[%c64, %c0_9], %27 {strides = array<i32>} : memref<144x512xbf16, #tpu.memory_space<vmem>>, vector<16x256xbf16>,
    %c255_i32 = arith.constant 255 : i32
    %29 = tpu.dynamic_rotate %2 by %c255_i32 dim 1 : vector<16x256xf32>, i32 -> vector<16x256xf32>
    %30 = vector.extract_strided_slice %0 {offsets = [4, 0], sizes = [1, 256], strides = [1, 1]} : vector<8x256xf32> to vector<1x256xf32>
    %31 = vector.broadcast %30 : vector<1x256xf32> to vector<16x256xf32>
    %32 = arith.mulf %29, %31 : vector<16x256xf32>
    %33 = arith.truncf %32 : vector<16x256xf32> to vector<16x256xbf16>
    %c80 = arith.constant 80 : index
    %c0_10 = arith.constant 0 : index
    %34 = vector.load %arg6[%c80, %c0_10] : memref<144x512xbf16, #tpu.memory_space<vmem>>, vector<16x256xbf16>
    tpu.vector_store %arg6[%c80, %c0_10], %33 {strides = array<i32>} : memref<144x512xbf16, #tpu.memory_space<vmem>>, vector<16x256xbf16>,
    %c241_i32 = arith.constant 241 : i32
    %35 = tpu.dynamic_rotate %2 by %c241_i32 dim 1 : vector<16x256xf32>, i32 -> vector<16x256xf32>
    %36 = vector.extract_strided_slice %0 {offsets = [5, 0], sizes = [1, 256], strides = [1, 1]} : vector<8x256xf32> to vector<1x256xf32>
    %37 = vector.broadcast %36 : vector<1x256xf32> to vector<16x256xf32>
    %38 = arith.mulf %35, %37 : vector<16x256xf32>
    %39 = arith.truncf %38 : vector<16x256xf32> to vector<16x256xbf16>
    %c96 = arith.constant 96 : index
    %c0_11 = arith.constant 0 : index
    %40 = vector.load %arg6[%c96, %c0_11] : memref<144x512xbf16, #tpu.memory_space<vmem>>, vector<16x256xbf16>
    tpu.vector_store %arg6[%c96, %c0_11], %39 {strides = array<i32>} : memref<144x512xbf16, #tpu.memory_space<vmem>>, vector<16x256xbf16>,
    %c240_i32 = arith.constant 240 : i32
    %41 = tpu.dynamic_rotate %2 by %c240_i32 dim 1 : vector<16x256xf32>, i32 -> vector<16x256xf32>
    %42 = vector.extract_strided_slice %0 {offsets = [6, 0], sizes = [1, 256], strides = [1, 1]} : vector<8x256xf32> to vector<1x256xf32>
    %43 = vector.broadcast %42 : vector<1x256xf32> to vector<16x256xf32>
    %44 = arith.mulf %41, %43 : vector<16x256xf32>
    %45 = arith.truncf %44 : vector<16x256xf32> to vector<16x256xbf16>
    %c112 = arith.constant 112 : index
    %c0_12 = arith.constant 0 : index
    %46 = vector.load %arg6[%c112, %c0_12] : memref<144x512xbf16, #tpu.memory_space<vmem>>, vector<16x256xbf16>
    tpu.vector_store %arg6[%c112, %c0_12], %45 {strides = array<i32>} : memref<144x512xbf16, #tpu.memory_space<vmem>>, vector<16x256xbf16>,
    %c239_i32 = arith.constant 239 : i32
    %47 = tpu.dynamic_rotate %2 by %c239_i32 dim 1 : vector<16x256xf32>, i32 -> vector<16x256xf32>
    %48 = vector.extract_strided_slice %0 {offsets = [7, 0], sizes = [1, 256], strides = [1, 1]} : vector<8x256xf32> to vector<1x256xf32>
    %49 = vector.broadcast %48 : vector<1x256xf32> to vector<16x256xf32>
    %50 = arith.mulf %47, %49 : vector<16x256xf32>
    %51 = arith.truncf %50 : vector<16x256xf32> to vector<16x256xbf16>
    %c128 = arith.constant 128 : index
    %c0_13 = arith.constant 0 : index
    %52 = vector.load %arg6[%c128, %c0_13] : memref<144x512xbf16, #tpu.memory_space<vmem>>, vector<16x256xbf16>
    tpu.vector_store %arg6[%c128, %c0_13], %51 {strides = array<i32>} : memref<144x512xbf16, #tpu.memory_space<vmem>>, vector<16x256xbf16>,
    %c1 = arith.constant 1 : index
    %c0_14 = arith.constant 0 : index
    %c0_15 = arith.constant 0 : index
    %53 = vector.load %arg1[%c1, %c0_14, %c0_15] : memref<2x16x256xf32, #tpu.memory_space<vmem>>, vector<1x16x256xf32>
    %54 = vector.shape_cast %53 : vector<1x16x256xf32> to vector<16x256xf32>
    %c17_i32_16 = arith.constant 17 : i32
    %55 = tpu.dynamic_rotate %54 by %c17_i32_16 dim 1 : vector<16x256xf32>, i32 -> vector<16x256xf32>
    %56 = vector.extract_strided_slice %0 {offsets = [0, 0], sizes = [1, 256], strides = [1, 1]} : vector<8x256xf32> to vector<1x256xf32>
    %57 = vector.broadcast %56 : vector<1x256xf32> to vector<16x256xf32>
    %58 = arith.mulf %55, %57 : vector<16x256xf32>
    %59 = arith.truncf %58 : vector<16x256xf32> to vector<16x256xbf16>
    %c0_17 = arith.constant 0 : index
    %c256 = arith.constant 256 : index
    %60 = vector.load %arg6[%c0_17, %c256] : memref<144x512xbf16, #tpu.memory_space<vmem>>, vector<16x256xbf16>
    tpu.vector_store %arg6[%c0_17, %c256], %59 {strides = array<i32>} : memref<144x512xbf16, #tpu.memory_space<vmem>>, vector<16x256xbf16>,
    %c16_i32_18 = arith.constant 16 : i32
    %61 = tpu.dynamic_rotate %54 by %c16_i32_18 dim 1 : vector<16x256xf32>, i32 -> vector<16x256xf32>
    %62 = vector.extract_strided_slice %0 {offsets = [1, 0], sizes = [1, 256], strides = [1, 1]} : vector<8x256xf32> to vector<1x256xf32>
    %63 = vector.broadcast %62 : vector<1x256xf32> to vector<16x256xf32>
    %64 = arith.mulf %61, %63 : vector<16x256xf32>
    %65 = arith.truncf %64 : vector<16x256xf32> to vector<16x256xbf16>
    %c16_19 = arith.constant 16 : index
    %c256_20 = arith.constant 256 : index
    %66 = vector.load %arg6[%c16_19, %c256_20] : memref<144x512xbf16, #tpu.memory_space<vmem>>, vector<16x256xbf16>
    tpu.vector_store %arg6[%c16_19, %c256_20], %65 {strides = array<i32>} : memref<144x512xbf16, #tpu.memory_space<vmem>>, vector<16x256xbf16>,
    %c15_i32_21 = arith.constant 15 : i32
    %67 = tpu.dynamic_rotate %54 by %c15_i32_21 dim 1 : vector<16x256xf32>, i32 -> vector<16x256xf32>
    %68 = vector.extract_strided_slice %0 {offsets = [2, 0], sizes = [1, 256], strides = [1, 1]} : vector<8x256xf32> to vector<1x256xf32>
    %69 = vector.broadcast %68 : vector<1x256xf32> to vector<16x256xf32>
    %70 = arith.mulf %67, %69 : vector<16x256xf32>
    %71 = arith.truncf %70 : vector<16x256xf32> to vector<16x256xbf16>
    %c32_22 = arith.constant 32 : index
    %c256_23 = arith.constant 256 : index
    %72 = vector.load %arg6[%c32_22, %c256_23] : memref<144x512xbf16, #tpu.memory_space<vmem>>, vector<16x256xbf16>
    tpu.vector_store %arg6[%c32_22, %c256_23], %71 {strides = array<i32>} : memref<144x512xbf16, #tpu.memory_space<vmem>>, vector<16x256xbf16>,
    %c1_i32_24 = arith.constant 1 : i32
    %73 = tpu.dynamic_rotate %54 by %c1_i32_24 dim 1 : vector<16x256xf32>, i32 -> vector<16x256xf32>
    %74 = vector.extract_strided_slice %0 {offsets = [3, 0], sizes = [1, 256], strides = [1, 1]} : vector<8x256xf32> to vector<1x256xf32>
    %75 = vector.broadcast %74 : vector<1x256xf32> to vector<16x256xf32>
    %76 = arith.mulf %73, %75 : vector<16x256xf32>
    %77 = arith.truncf %76 : vector<16x256xf32> to vector<16x256xbf16>
    %c48_25 = arith.constant 48 : index
    %c256_26 = arith.constant 256 : index
    %78 = vector.load %arg6[%c48_25, %c256_26] : memref<144x512xbf16, #tpu.memory_space<vmem>>, vector<16x256xbf16>
    tpu.vector_store %arg6[%c48_25, %c256_26], %77 {strides = array<i32>} : memref<144x512xbf16, #tpu.memory_space<vmem>>, vector<16x256xbf16>,
    %79 = arith.truncf %54 : vector<16x256xf32> to vector<16x256xbf16>
    %c64_27 = arith.constant 64 : index
    %c256_28 = arith.constant 256 : index
    %80 = vector.load %arg6[%c64_27, %c256_28] : memref<144x512xbf16, #tpu.memory_space<vmem>>, vector<16x256xbf16>
    tpu.vector_store %arg6[%c64_27, %c256_28], %79 {strides = array<i32>} : memref<144x512xbf16, #tpu.memory_space<vmem>>, vector<16x256xbf16>,
    %c255_i32_29 = arith.constant 255 : i32
    %81 = tpu.dynamic_rotate %54 by %c255_i32_29 dim 1 : vector<16x256xf32>, i32 -> vector<16x256xf32>
    %82 = vector.extract_strided_slice %0 {offsets = [4, 0], sizes = [1, 256], strides = [1, 1]} : vector<8x256xf32> to vector<1x256xf32>
    %83 = vector.broadcast %82 : vector<1x256xf32> to vector<16x256xf32>
    %84 = arith.mulf %81, %83 : vector<16x256xf32>
    %85 = arith.truncf %84 : vector<16x256xf32> to vector<16x256xbf16>
    %c80_30 = arith.constant 80 : index
    %c256_31 = arith.constant 256 : index
    %86 = vector.load %arg6[%c80_30, %c256_31] : memref<144x512xbf16, #tpu.memory_space<vmem>>, vector<16x256xbf16>
    tpu.vector_store %arg6[%c80_30, %c256_31], %85 {strides = array<i32>} : memref<144x512xbf16, #tpu.memory_space<vmem>>, vector<16x256xbf16>,
    %c241_i32_32 = arith.constant 241 : i32
    %87 = tpu.dynamic_rotate %54 by %c241_i32_32 dim 1 : vector<16x256xf32>, i32 -> vector<16x256xf32>
    %88 = vector.extract_strided_slice %0 {offsets = [5, 0], sizes = [1, 256], strides = [1, 1]} : vector<8x256xf32> to vector<1x256xf32>
    %89 = vector.broadcast %88 : vector<1x256xf32> to vector<16x256xf32>
    %90 = arith.mulf %87, %89 : vector<16x256xf32>
    %91 = arith.truncf %90 : vector<16x256xf32> to vector<16x256xbf16>
    %c96_33 = arith.constant 96 : index
    %c256_34 = arith.constant 256 : index
    %92 = vector.load %arg6[%c96_33, %c256_34] : memref<144x512xbf16, #tpu.memory_space<vmem>>, vector<16x256xbf16>
    tpu.vector_store %arg6[%c96_33, %c256_34], %91 {strides = array<i32>} : memref<144x512xbf16, #tpu.memory_space<vmem>>, vector<16x256xbf16>,
    %c240_i32_35 = arith.constant 240 : i32
    %93 = tpu.dynamic_rotate %54 by %c240_i32_35 dim 1 : vector<16x256xf32>, i32 -> vector<16x256xf32>
    %94 = vector.extract_strided_slice %0 {offsets = [6, 0], sizes = [1, 256], strides = [1, 1]} : vector<8x256xf32> to vector<1x256xf32>
    %95 = vector.broadcast %94 : vector<1x256xf32> to vector<16x256xf32>
    %96 = arith.mulf %93, %95 : vector<16x256xf32>
    %97 = arith.truncf %96 : vector<16x256xf32> to vector<16x256xbf16>
    %c112_36 = arith.constant 112 : index
    %c256_37 = arith.constant 256 : index
    %98 = vector.load %arg6[%c112_36, %c256_37] : memref<144x512xbf16, #tpu.memory_space<vmem>>, vector<16x256xbf16>
    tpu.vector_store %arg6[%c112_36, %c256_37], %97 {strides = array<i32>} : memref<144x512xbf16, #tpu.memory_space<vmem>>, vector<16x256xbf16>,
    %c239_i32_38 = arith.constant 239 : i32
    %99 = tpu.dynamic_rotate %54 by %c239_i32_38 dim 1 : vector<16x256xf32>, i32 -> vector<16x256xf32>
    %100 = vector.extract_strided_slice %0 {offsets = [7, 0], sizes = [1, 256], strides = [1, 1]} : vector<8x256xf32> to vector<1x256xf32>
    %101 = vector.broadcast %100 : vector<1x256xf32> to vector<16x256xf32>
    %102 = arith.mulf %99, %101 : vector<16x256xf32>
    %103 = arith.truncf %102 : vector<16x256xf32> to vector<16x256xbf16>
    %c128_39 = arith.constant 128 : index
    %c256_40 = arith.constant 256 : index
    %104 = vector.load %arg6[%c128_39, %c256_40] : memref<144x512xbf16, #tpu.memory_space<vmem>>, vector<16x256xbf16>
    tpu.vector_store %arg6[%c128_39, %c256_40], %103 {strides = array<i32>} : memref<144x512xbf16, #tpu.memory_space<vmem>>, vector<16x256xbf16>,
    %c0_41 = arith.constant 0 : index
    %c0_42 = arith.constant 0 : index
    %105 = vector.load %arg2[%c0_41, %c0_42] : memref<4x144xbf16, #tpu.memory_space<vmem>>, vector<4x144xbf16>
    %c0_43 = arith.constant 0 : index
    %c0_44 = arith.constant 0 : index
    %106 = vector.load %arg6[%c0_43, %c0_44] : memref<144x512xbf16, #tpu.memory_space<vmem>>, vector<144x512xbf16>
    %cst = arith.constant dense<0.000000e+00> : vector<4x512xf32>
    %107 = tpu.matmul %105, %106, %cst {dimension_numbers = #tpu.dot_dimension_numbers<[1], [0], [0], [1], [0, 0, 1, 1], [], []>} : vector<4x144xbf16>, vector<144x512xbf16>, vector<4x512xf32> -> vector<4x512xf32>
    %c0_45 = arith.constant 0 : index
    %c0_46 = arith.constant 0 : index
    %c0_47 = arith.constant 0 : index
    %c0_48 = arith.constant 0 : index
    %108 = vector.load %arg4[%c0_45, %c0_46, %c0_47, %c0_48] : memref<2x2x4x1xf32, #tpu.memory_space<vmem>>, vector<1x1x4x1xf32>
    %109 = vector.shape_cast %108 : vector<1x1x4x1xf32> to vector<4x1xf32>
    %c0_49 = arith.constant 0 : index
    %c1_50 = arith.constant 1 : index
    %c0_51 = arith.constant 0 : index
    %c0_52 = arith.constant 0 : index
    %110 = vector.load %arg4[%c0_49, %c1_50, %c0_51, %c0_52] : memref<2x2x4x1xf32, #tpu.memory_space<vmem>>, vector<1x1x4x1xf32>
    %111 = vector.shape_cast %110 : vector<1x1x4x1xf32> to vector<4x1xf32>
    %112 = vector.extract_strided_slice %107 {offsets = [0, 0], sizes = [4, 256], strides = [1, 1]} : vector<4x512xf32> to vector<4x256xf32>
    %113 = vector.broadcast %109 : vector<4x1xf32> to vector<4x256xf32>
    %114 = arith.mulf %112, %113 : vector<4x256xf32>
    %115 = vector.broadcast %111 : vector<4x1xf32> to vector<4x256xf32>
    %116 = arith.addf %114, %115 : vector<4x256xf32>
    %cst_53 = arith.constant 0.000000e+00 : f32
    %117 = vector.broadcast %cst_53 : f32 to vector<4x256xf32>
    %118 = arith.cmpf oge, %116, %117 : vector<4x256xf32>
    %cst_54 = arith.constant 0.00999999977 : f32
    %119 = vector.broadcast %cst_54 : f32 to vector<4x256xf32>
    %120 = arith.mulf %119, %116 : vector<4x256xf32>
    %121 = arith.select %118, %116, %120 : vector<4x256xi1>, vector<4x256xf32>
    %c0_55 = arith.constant 0 : index
    %c0_56 = arith.constant 0 : index
    %c0_57 = arith.constant 0 : index
    %122 = vector.load %arg5[%c0_55, %c0_56, %c0_57] : memref<2x4x256xf32, #tpu.memory_space<vmem>>, vector<1x4x256xf32>
    %123 = vector.shape_cast %122 : vector<1x4x256xf32> to vector<4x256xf32>
    %124 = vector.shape_cast %121 : vector<4x256xf32> to vector<1x4x256xf32>
    tpu.vector_store %arg5[%c0_55, %c0_56, %c0_57], %124 {strides = array<i32>} : memref<2x4x256xf32, #tpu.memory_space<vmem>>, vector<1x4x256xf32>,
    %c1_58 = arith.constant 1 : index
    %c0_59 = arith.constant 0 : index
    %c0_60 = arith.constant 0 : index
    %c0_61 = arith.constant 0 : index
    %125 = vector.load %arg4[%c1_58, %c0_59, %c0_60, %c0_61] : memref<2x2x4x1xf32, #tpu.memory_space<vmem>>, vector<1x1x4x1xf32>
    %126 = vector.shape_cast %125 : vector<1x1x4x1xf32> to vector<4x1xf32>
    %c1_62 = arith.constant 1 : index
    %c1_63 = arith.constant 1 : index
    %c0_64 = arith.constant 0 : index
    %c0_65 = arith.constant 0 : index
    %127 = vector.load %arg4[%c1_62, %c1_63, %c0_64, %c0_65] : memref<2x2x4x1xf32, #tpu.memory_space<vmem>>, vector<1x1x4x1xf32>
    %128 = vector.shape_cast %127 : vector<1x1x4x1xf32> to vector<4x1xf32>
    %129 = vector.extract_strided_slice %107 {offsets = [0, 256], sizes = [4, 256], strides = [1, 1]} : vector<4x512xf32> to vector<4x256xf32>
    %130 = vector.broadcast %126 : vector<4x1xf32> to vector<4x256xf32>
    %131 = arith.mulf %129, %130 : vector<4x256xf32>
    %132 = vector.broadcast %128 : vector<4x1xf32> to vector<4x256xf32>
    %133 = arith.addf %131, %132 : vector<4x256xf32>
    %cst_66 = arith.constant 0.000000e+00 : f32
    %134 = vector.broadcast %cst_66 : f32 to vector<4x256xf32>
    %135 = arith.cmpf oge, %133, %134 : vector<4x256xf32>
    %cst_67 = arith.constant 0.00999999977 : f32
    %136 = vector.broadcast %cst_67 : f32 to vector<4x256xf32>
    %137 = arith.mulf %136, %133 : vector<4x256xf32>
    %138 = arith.select %135, %133, %137 : vector<4x256xi1>, vector<4x256xf32>
    %c1_68 = arith.constant 1 : index
    %c0_69 = arith.constant 0 : index
    %c0_70 = arith.constant 0 : index
    %139 = vector.load %arg5[%c1_68, %c0_69, %c0_70] : memref<2x4x256xf32, #tpu.memory_space<vmem>>, vector<1x4x256xf32>
    %140 = vector.shape_cast %139 : vector<1x4x256xf32> to vector<4x256xf32>
    %141 = vector.shape_cast %138 : vector<4x256xf32> to vector<1x4x256xf32>
    tpu.vector_store %arg5[%c1_68, %c0_69, %c0_70], %141 {strides = array<i32>} : memref<2x4x256xf32, #tpu.memory_space<vmem>>, vector<1x4x256xf32>,
    return
  }
  func.func @transform_0(%arg0: i32) -> (i32, i32, i32) {
    %c0_i32 = arith.constant 0 : i32
    %c0_i32_0 = arith.constant 0 : i32
    %c0_i32_1 = arith.constant 0 : i32
    %c0_i32_2 = arith.constant 0 : i32
    return %c0_i32, %c0_i32_0, %c0_i32_1 : i32, i32, i32
  }
  func.func @transform_1(%arg0: i32) -> (i32, i32) {
    %c0_i32 = arith.constant 0 : i32
    %c0_i32_0 = arith.constant 0 : i32
    %c0_i32_1 = arith.constant 0 : i32
    return %c0_i32, %c0_i32_0 : i32, i32
  }
  func.func @transform_2(%arg0: i32) -> (i32, i32) {
    %c0_i32 = arith.constant 0 : i32
    %c0_i32_0 = arith.constant 0 : i32
    %c0_i32_1 = arith.constant 0 : i32
    return %c0_i32, %c0_i32_0 : i32, i32
  }
  func.func @transform_3(%arg0: i32) -> (i32, i32, i32, i32) {
    %c0_i32 = arith.constant 0 : i32
    %c0_i32_0 = arith.constant 0 : i32
    %c0_i32_1 = arith.constant 0 : i32
    %c0_i32_2 = arith.constant 0 : i32
    %c0_i32_3 = arith.constant 0 : i32
    return %c0_i32, %c0_i32_0, %c0_i32_1, %c0_i32_2 : i32, i32, i32, i32
  }
  func.func @transform_4(%arg0: i32) -> (i32, i32, i32) {
    %c0_i32 = arith.constant 0 : i32
    %c0_i32_0 = arith.constant 0 : i32
    %c0_i32_1 = arith.constant 0 : i32
    %c0_i32_2 = arith.constant 0 : i32
    return %c0_i32, %c0_i32_0, %c0_i32_1 : i32, i32, i32
  }
}

</mosaic_0001>

<bundles_post_ra>
// kernel: cno_block_forward.1
= control target key start
LH: loop header
LB: loop body
LE: loop exit
PB: predicated region body
PF: predicated region fallthrough
CT: control target
= control target key end

     0   :  { %s648_s19 = smov 17   ;;  %s649_s6 = smov 16   ;;  %v32_v8 = vlaneseq  ;;  %vm478_vm0 = vcmask 130048   ;;  %v656_v30 = vmov 0   ;;  %s1003_s0 = inlined_call_operand.vmem [shape: f32[2,16,256], index: 0, kind: input, shape index: {}]   ;;  %s1004_s2 = inlined_call_operand.vmem [shape: f32[8,256], index: 2, kind: input, shape index: {}]   ;;  %s1005_s1 = inlined_call_operand.vmem [shape: bf16[4,144], index: 1, kind: input, shape index: {}]   ;;  %s1006_s3 = inlined_call_operand.vmem [shape: f32[2,2,4,1], index: 3, kind: input, shape index: {}]   ;;  %s1007_s4 = inlined_call_operand.vmem [shape: f32[2,4,256], index: 4, kind: output, shape index: {}]  }
   0x1   :  { %v685_v0 = vld [vmem:[%s1003_s0 + $0x8] sm:$0xff]  ;;  %v690_v1 = vld [vmem:[%s1003_s0] sm:$0xff]  ;;  %v697_v2 = vld [vmem:[%s1003_s0 + $0x18] sm:$0xff]  ;;  %s651_s7 = smov 1   ;;  %s652_s8 = smov 127   ;;  %647 = vset.pattern.permute.xlu1 %v656_v30  ;;  %646 = vset.pattern.permute.xlu0 %v656_v30 }
   0x2   :  { %28 = vrot.lane.b32.xlu1 %v685_v0, %s648_s19  ;;  %24 = vrot.lane.b32.xlu0 %v690_v1, %s648_s19  ;;  %v702_v3 = vld [vmem:[%s1003_s0 + $0x10] sm:$0xff]  ;;  %v714_v5 = vld [vmem:[%s1003_s0 + $0x20] sm:$0xff]  ;;  %s653_s9 = smov 113   ;;  %s654_s10 = smov 112   ;;  %v776_v9 = vshrl.u32 %v32_v8, 7  ;;  %v780_v10 = vand.u32 127, %v32_v8 }
   0x3   :  { %v709_v4 = vld [vmem:[%s1003_s0 + $0x30] sm:$0xff]  ;;  %v721_v6 = vld [vmem:[%s1003_s0 + $0x38] sm:$0xff]  ;;  %v726_v7 = vld [vmem:[%s1003_s0 + $0x28] sm:$0xff]  ;;  %s650_s0 = smov 15   ;;  %s655_s13 = smov 111  }
   0x4   :  { %v41_v11 = vsub.s32 0, %v776_v9  ;;  %v786_v12 = vld.sshfl [vmem:[%s1005_s1] sm:$0x33 pattern:$0x76325410]  ;;  %vm34_vm1 = vcmp.lt.s32.totalorder %v780_v10, 17 }
   0x5   :  { %v795_v13 = vld [vmem:[%s1004_s2] sm:$0xff]  ;;  %v476_v14 = vcombine.high %v786_v12, %v786_v12  ;;  %v803_v15 = vld [vmem:[%s1004_s2 + $0x8] sm:$0xff]  ;;  %v70_v38 = vsub.s32 1, %v776_v9  ;;  %vm63_vm2 = vcmp.lt.s32.totalorder %v780_v10, 16  ;;  %vm92_vm3 = vcmp.lt.s32.totalorder %v780_v10, 15 }
   0x6   :  { %30 = vrot.lane.b32.xlu1 %v697_v2, %s648_s19  ;;  %26 = vrot.lane.b32.xlu0 %v702_v3, %s648_s19  ;;  %v42_v18 = vrot.slane %v795_v13, %v41_v11  ;;  %v46_v20 = vrot.slane %v803_v15, %v41_v11  ;;  %v634_v35 = vld [vmem:[%s1006_s3 + $0x8] sm:$0xf]  ;;  %v564_v39 = vld [vmem:[%s1006_s3] sm:$0xf]  ;;  %vm121_vm4 = vcmp.lt.s32.totalorder %v780_v10, 1  ;;  %vm154_vm5 = vcmp.lt.s32.totalorder %v780_v10, 127 }
   0x7   :  { %631 = vmatprep.mubr.msk.bf16.mxu0 %vm478_vm0, %v476_v14  ;;  %632 = vmatprep.mubr.msk.bf16.mxu1 %vm478_vm0, %v476_v14  ;;  %v633_v48 = vld [vmem:[%s1006_s3 + $0x4] sm:$0xf]  ;;  %v635_v53 = vld [vmem:[%s1006_s3 + $0xc] sm:$0xf]  ;;  %v71_v54 = vrot.slane %v795_v13, %v70_v38  ;;  %v75_v55 = vrot.slane %v803_v15, %v70_v38  ;;  %vm183_vm6 = vcmp.lt.s32.totalorder %v780_v10, 113  ;;  %vm212_vm7 = vcmp.lt.s32.totalorder %v780_v10, 112 }
   0x8   :  { %vm241_vm8 = vcmp.lt.s32.totalorder %v780_v10, 111 }
   0xa   :  { %269 = vrot.lane.b32.xlu1 %v709_v4, %s648_s19  ;;  %267 = vrot.lane.b32.xlu0 %v714_v5, %s648_s19 }
   0xe   :  { %273 = vrot.lane.b32.xlu1 %v721_v6, %s648_s19  ;;  %271 = vrot.lane.b32.xlu0 %v726_v7, %s648_s19 }
  0x12   :  { %57 = vrot.lane.b32.xlu1 %v702_v3, %s649_s6  ;;  %55 = vrot.lane.b32.xlu0 %v690_v1, %s649_s6 }
  0x16   :  { %61 = vrot.lane.b32.xlu1 %v697_v2, %s649_s6  ;;  %59 = vrot.lane.b32.xlu0 %v685_v0, %s649_s6 }
  0x1a   :  { %289 = vrot.lane.b32.xlu1 %v709_v4, %s649_s6  ;;  %287 = vrot.lane.b32.xlu0 %v714_v5, %s649_s6 }
  0x1e   :  { %293 = vrot.lane.b32.xlu1 %v721_v6, %s649_s6  ;;  %291 = vrot.lane.b32.xlu0 %v726_v7, %s649_s6 }
  0x22   :  { %86 = vrot.lane.b32.xlu1 %v702_v3, %s650_s0  ;;  %84 = vrot.lane.b32.xlu0 %v690_v1, %s650_s0 }
  0x26   :  { %90 = vrot.lane.b32.xlu1 %v697_v2, %s650_s0  ;;  %88 = vrot.lane.b32.xlu0 %v685_v0, %s650_s0 }
  0x2a   :  { %309 = vrot.lane.b32.xlu1 %v709_v4, %s650_s0  ;;  %307 = vrot.lane.b32.xlu0 %v714_v5, %s650_s0 }
  0x2e   :  { %313 = vrot.lane.b32.xlu1 %v721_v6, %s650_s0  ;;  %311 = vrot.lane.b32.xlu0 %v726_v7, %s650_s0 }
  0x32   :  { %115 = vrot.lane.b32.xlu1 %v702_v3, %s651_s7  ;;  %113 = vrot.lane.b32.xlu0 %v690_v1, %s651_s7 }
  0x36   :  { %119 = vrot.lane.b32.xlu1 %v697_v2, %s651_s7  ;;  %117 = vrot.lane.b32.xlu0 %v685_v0, %s651_s7 }
  0x3a   :  { %329 = vrot.lane.b32.xlu1 %v709_v4, %s651_s7  ;;  %327 = vrot.lane.b32.xlu0 %v714_v5, %s651_s7 }
  0x3e   :  { %333 = vrot.lane.b32.xlu1 %v721_v6, %s651_s7  ;;  %331 = vrot.lane.b32.xlu0 %v726_v7, %s651_s7 }
  0x42   :  { %148 = vrot.lane.b32.xlu1 %v702_v3, %s652_s8  ;;  %146 = vrot.lane.b32.xlu0 %v690_v1, %s652_s8 }
  0x46   :  { %152 = vrot.lane.b32.xlu1 %v697_v2, %s652_s8  ;;  %150 = vrot.lane.b32.xlu0 %v685_v0, %s652_s8 }
  0x4a   :  { %353 = vrot.lane.b32.xlu1 %v709_v4, %s652_s8  ;;  %351 = vrot.lane.b32.xlu0 %v714_v5, %s652_s8 }
  0x4e   :  { %357 = vrot.lane.b32.xlu1 %v721_v6, %s652_s8  ;;  %355 = vrot.lane.b32.xlu0 %v726_v7, %s652_s8 }
  0x52   :  { %177 = vrot.lane.b32.xlu1 %v702_v3, %s653_s9  ;;  %175 = vrot.lane.b32.xlu0 %v690_v1, %s653_s9 }
  0x56   :  { %181 = vrot.lane.b32.xlu1 %v697_v2, %s653_s9  ;;  %179 = vrot.lane.b32.xlu0 %v685_v0, %s653_s9 }
  0x5a   :  { %373 = vrot.lane.b32.xlu1 %v709_v4, %s653_s9  ;;  %371 = vrot.lane.b32.xlu0 %v714_v5, %s653_s9 }
  0x5e   :  { %377 = vrot.lane.b32.xlu1 %v721_v6, %s653_s9  ;;  %375 = vrot.lane.b32.xlu0 %v726_v7, %s653_s9 }
  0x62   :  { %206 = vrot.lane.b32.xlu1 %v702_v3, %s654_s10  ;;  %204 = vrot.lane.b32.xlu0 %v690_v1, %s654_s10 }
  0x66   :  { %210 = vrot.lane.b32.xlu1 %v697_v2, %s654_s10  ;;  %208 = vrot.lane.b32.xlu0 %v685_v0, %s654_s10 }
  0x6a   :  { %393 = vrot.lane.b32.xlu1 %v709_v4, %s654_s10  ;;  %391 = vrot.lane.b32.xlu0 %v714_v5, %s654_s10 }
  0x6e   :  { %397 = vrot.lane.b32.xlu1 %v721_v6, %s654_s10  ;;  %395 = vrot.lane.b32.xlu0 %v726_v7, %s654_s10 }
  0x72   :  { %235 = vrot.lane.b32.xlu1 %v702_v3, %s655_s13  ;;  %233 = vrot.lane.b32.xlu0 %v690_v1, %s655_s13 }
  0x74   :  { %v29_v16 = vpop.permute.xlu1 %28  ;;  %v25_v17 = vpop.permute.xlu0 %24 }
  0x75   :  { %v37_v19 = vsel %vm34_vm1, %v29_v16, %v25_v17  ;;  %v35_v21 = vsel %vm34_vm1, %v25_v17, %v29_v16 }
  0x76   :  { %239 = vrot.lane.b32.xlu1 %v697_v2, %s655_s13  ;;  %237 = vrot.lane.b32.xlu0 %v685_v0, %s655_s13  ;;  %v47_v24 = vmul.f32 %v42_v18, %v37_v19  ;;  %v48_v28 = vmul.f32 %v46_v20, %v35_v21  ;;  %v99_v21 = vsub.s32 2, %v776_v9 }
  0x78   :  { %v31_v22 = vpop.permute.xlu1 %30  ;;  %v27_v23 = vpop.permute.xlu0 %26 }
  0x79   :  { %v36_v25 = vsel %vm34_vm1, %v27_v23, %v31_v22  ;;  %v38_v26 = vsel %vm34_vm1, %v31_v22, %v27_v23 }
  0x7a   :  { %v49_v27 = vmul.f32 %v42_v18, %v38_v26  ;;  %413 = vrot.lane.b32.xlu1 %v709_v4, %s655_s13  ;;  %411 = vrot.lane.b32.xlu0 %v714_v5, %s655_s13  ;;  %v50_v29 = vmul.f32 %v46_v20, %v36_v25 }
  0x7c   :  { %v270_v31 = vpop.permute.xlu1 %269  ;;  %v268_v32 = vpop.permute.xlu0 %267  ;;  %v52_v33 = vpack.c.bf16 %v50_v29, %v48_v28  ;;  %v51_v34 = vpack.c.bf16 %v49_v27, %v47_v24 }
  0x7e   :  { %417 = vrot.lane.b32.xlu1 %v721_v6, %s655_s13  ;;  %415 = vrot.lane.b32.xlu0 %v726_v7, %s655_s13 }
  0x7f   :  { %482 = vmatprep.subr.bf16.mxu0 %v52_v33 }
  0x80   :  { %483 = vmatpush1.bf16.msra.mxu0 %v51_v34  ;;  %v274_v36 = vpop.permute.xlu1 %273  ;;  %v272_v37 = vpop.permute.xlu0 %271  ;;  %v100_v34 = vrot.slane %v795_v13, %v99_v21 }
  0x81   :  { %v276_v40 = vsel %vm34_vm1, %v270_v31, %v274_v36  ;;  %v278_v41 = vsel %vm34_vm1, %v274_v36, %v270_v31  ;;  %v275_v42 = vsel %vm34_vm1, %v268_v32, %v272_v37  ;;  %v277_v43 = vsel %vm34_vm1, %v272_v37, %v268_v32 }
  0x82   :  { %v281_v44 = vmul.f32 %v278_v41, %v42_v18  ;;  %v279_v45 = vmul.f32 %v277_v43, %v42_v18  ;;  %v280_v46 = vmul.f32 %v275_v42, %v46_v20  ;;  %v282_v47 = vmul.f32 %v276_v40, %v46_v20  ;;  %598 = vperm.xlu1 %647, %v634_v35  }
  0x83   :  { %569 = vperm.xlu0 %646, %v564_v39   ;;  %v104_v35 = vrot.slane %v803_v15, %v99_v21 }
  0x84   :  { %v58_v49 = vpop.permute.xlu1 %57  ;;  %v56_v50 = vpop.permute.xlu0 %55  ;;  %v284_v51 = vpack.c.bf16 %v282_v47, %v280_v46  ;;  %v283_v52 = vpack.c.bf16 %v281_v44, %v279_v45 }
  0x86   :  { %523 = vmatprep.subr.bf16.mxu1 %v284_v51  ;;  %576 = vperm.xlu1 %647, %v633_v48  }
  0x87   :  { %524 = vmatpush1.bf16.msra.mxu1 %v283_v52  ;;  %605 = vperm.xlu0 %646, %v635_v53   ;;  %v128_v52 = vsub.s32 3, %v776_v9 }
  0x88   :  { %v62_v56 = vpop.permute.xlu1 %61  ;;  %v60_v57 = vpop.permute.xlu0 %59 }
  0x89   :  { %v65_v58 = vsel %vm63_vm2, %v58_v49, %v62_v56  ;;  %v67_v59 = vsel %vm63_vm2, %v62_v56, %v58_v49  ;;  %v64_v60 = vsel %vm63_vm2, %v56_v50, %v60_v57  ;;  %v66_v61 = vsel %vm63_vm2, %v60_v57, %v56_v50 }
  0x8a   :  { %v78_v62 = vmul.f32 %v71_v54, %v67_v59  ;;  %v79_v63 = vmul.f32 %v75_v55, %v65_v58  ;;  %v76_v8 = vmul.f32 %v71_v54, %v66_v61  ;;  %v77_v11 = vmul.f32 %v75_v55, %v64_v60 }
  0x8c   :  { %v290_v14 = vpop.permute.xlu1 %289  ;;  %v288_v16 = vpop.permute.xlu0 %287  ;;  %v81_v17 = vpack.c.bf16 %v79_v63, %v77_v11  ;;  %v80_v18 = vpack.c.bf16 %v78_v62, %v76_v8  ;;  %v129_v11 = vrot.slane %v795_v13, %v128_v52 }
  0x8e   :  { %484 = vmatprep.subr.bf16.mxu0 %v81_v17 }
  0x8f   :  { %485 = vmatpush1.bf16.msra.mxu0 %v80_v18 }
  0x90   :  { %v294_v19 = vpop.permute.xlu1 %293  ;;  %v292_v20 = vpop.permute.xlu0 %291 }
  0x91   :  { %v296_v22 = vsel %vm63_vm2, %v290_v14, %v294_v19  ;;  %v298_v23 = vsel %vm63_vm2, %v294_v19, %v290_v14  ;;  %v295_v24 = vsel %vm63_vm2, %v288_v16, %v292_v20  ;;  %v297_v25 = vsel %vm63_vm2, %v292_v20, %v288_v16 }
  0x92   :  { %v301_v26 = vmul.f32 %v298_v23, %v71_v54  ;;  %v302_v27 = vmul.f32 %v296_v22, %v75_v55  ;;  %v299_v28 = vmul.f32 %v297_v25, %v71_v54  ;;  %v300_v29 = vmul.f32 %v295_v24, %v75_v55 }
  0x93   :  { %v133_v14 = vrot.slane %v803_v15, %v128_v52 }
  0x94   :  { %v87_v30 = vpop.permute.xlu1 %86  ;;  %v85_v31 = vpop.permute.xlu0 %84  ;;  %v304_v32 = vpack.c.bf16 %v302_v27, %v300_v29  ;;  %v303_v33 = vpack.c.bf16 %v301_v26, %v299_v28 }
  0x96   :  { %525 = vmatprep.subr.bf16.mxu1 %v304_v32 }
  0x97   :  { %526 = vmatpush1.bf16.msra.mxu1 %v303_v33 }
  0x98   :  { %v91_v36 = vpop.permute.xlu1 %90  ;;  %v89_v37 = vpop.permute.xlu0 %88 }
  0x99   :  { %v94_v38 = vsel %vm92_vm3, %v87_v30, %v91_v36  ;;  %v96_v39 = vsel %vm92_vm3, %v91_v36, %v87_v30  ;;  %v93_v40 = vsel %vm92_vm3, %v85_v31, %v89_v37  ;;  %v95_v41 = vsel %vm92_vm3, %v89_v37, %v85_v31 }
  0x9a   :  { %v107_v42 = vmul.f32 %v100_v34, %v96_v39  ;;  %v108_v43 = vmul.f32 %v104_v35, %v94_v38  ;;  %v105_v44 = vmul.f32 %v100_v34, %v95_v41  ;;  %v106_v45 = vmul.f32 %v104_v35, %v93_v40 }
  0x9b   :  { %v143_v30 = vpack.c.bf16 %v697_v2, %v685_v0  ;;  %v142_v31 = vpack.c.bf16 %v702_v3, %v690_v1 }
  0x9c   :  { %v310_v46 = vpop.permute.xlu1 %309  ;;  %v308_v47 = vpop.permute.xlu0 %307  ;;  %v110_v48 = vpack.c.bf16 %v108_v43, %v106_v45  ;;  %v109_v49 = vpack.c.bf16 %v107_v42, %v105_v44  ;;  %v348_v43 = vpack.c.bf16 %v721_v6, %v726_v7 }
  0x9e   :  { %486 = vmatprep.subr.bf16.mxu0 %v110_v48 }
  0x9f   :  { %487 = vmatpush1.bf16.msra.mxu0 %v109_v49 }
  0xa0   :  { %v314_v50 = vpop.permute.xlu1 %313  ;;  %v312_v51 = vpop.permute.xlu0 %311 }
  0xa1   :  { %v316_v53 = vsel %vm92_vm3, %v310_v46, %v314_v50  ;;  %v318_v54 = vsel %vm92_vm3, %v314_v50, %v310_v46  ;;  %v315_v55 = vsel %vm92_vm3, %v308_v47, %v312_v51  ;;  %v317_v56 = vsel %vm92_vm3, %v312_v51, %v308_v47 }
  0xa2   :  { %v321_v57 = vmul.f32 %v318_v54, %v100_v34  ;;  %v322_v58 = vmul.f32 %v316_v53, %v104_v35  ;;  %v319_v59 = vmul.f32 %v317_v56, %v100_v34  ;;  %v320_v60 = vmul.f32 %v315_v55, %v104_v35 }
  0xa3   :  { %v161_v34 = vsub.s32 4, %v776_v9  ;;  %v347_v46 = vpack.c.bf16 %v709_v4, %v714_v5 }
  0xa4   :  { %v116_v61 = vpop.permute.xlu1 %115  ;;  %v114_v62 = vpop.permute.xlu0 %113  ;;  %v324_v63 = vpack.c.bf16 %v322_v58, %v320_v60  ;;  %v323_v8 = vpack.c.bf16 %v321_v57, %v319_v59  ;;  %v190_v59 = vsub.s32 5, %v776_v9 }
  0xa5   :  { %v162_v44 = vrot.slane %v795_v13, %v161_v34  ;;  %v166_v45 = vrot.slane %v803_v15, %v161_v34 }
  0xa6   :  { %527 = vmatprep.subr.bf16.mxu1 %v324_v63 }
  0xa7   :  { %528 = vmatpush1.bf16.msra.mxu1 %v323_v8 }
  0xa8   :  { %v120_v16 = vpop.permute.xlu1 %119  ;;  %v118_v17 = vpop.permute.xlu0 %117 }
  0xa9   :  { %v123_v18 = vsel %vm121_vm4, %v116_v61, %v120_v16  ;;  %v125_v19 = vsel %vm121_vm4, %v120_v16, %v116_v61  ;;  %v122_v20 = vsel %vm121_vm4, %v114_v62, %v118_v17  ;;  %v124_v21 = vsel %vm121_vm4, %v118_v17, %v114_v62 }
  0xaa   :  { %v136_v22 = vmul.f32 %v129_v11, %v125_v19  ;;  %v137_v23 = vmul.f32 %v133_v14, %v123_v18  ;;  %v134_v24 = vmul.f32 %v129_v11, %v124_v21  ;;  %v135_v25 = vmul.f32 %v133_v14, %v122_v20 }
  0xab   :  { %v191_v21 = vrot.slane %v795_v13, %v190_v59 }
  0xac   :  { %v330_v26 = vpop.permute.xlu1 %329  ;;  %v328_v27 = vpop.permute.xlu0 %327  ;;  %v139_v28 = vpack.c.bf16 %v137_v23, %v135_v25  ;;  %v138_v29 = vpack.c.bf16 %v136_v22, %v134_v24  ;;  %v195_v22 = vrot.slane %v803_v15, %v190_v59 }
  0xae   :  { %488 = vmatprep.subr.bf16.mxu0 %v139_v28 }
  0xaf   :  { %489 = vmatpush1.bf16.msra.mxu0 %v138_v29 }
  0xb0   :  { %v334_v32 = vpop.permute.xlu1 %333  ;;  %v332_v33 = vpop.permute.xlu0 %331  ;;  %490 = vmatprep.subr.bf16.mxu0 %v143_v30 }
  0xb1   :  { %v336_v35 = vsel %vm121_vm4, %v330_v26, %v334_v32  ;;  %v338_v36 = vsel %vm121_vm4, %v334_v32, %v330_v26  ;;  %v335_v37 = vsel %vm121_vm4, %v328_v27, %v332_v33  ;;  %v337_v0 = vsel %vm121_vm4, %v332_v33, %v328_v27 }
  0xb2   :  { %v341_v2 = vmul.f32 %v338_v36, %v129_v11  ;;  %v342_v38 = vmul.f32 %v336_v35, %v133_v14  ;;  %v339_v1 = vmul.f32 %v337_v0, %v129_v11  ;;  %v340_v3 = vmul.f32 %v335_v37, %v133_v14 }
  0xb3   :  { %491 = vmatpush1.bf16.msra.mxu0 %v142_v31 }
  0xb4   :  { %v149_v39 = vpop.permute.xlu1 %148  ;;  %v147_v40 = vpop.permute.xlu0 %146  ;;  %v344_v41 = vpack.c.bf16 %v342_v38, %v340_v3  ;;  %v343_v42 = vpack.c.bf16 %v341_v2, %v339_v1  ;;  %v219_v2 = vsub.s32 6, %v776_v9 }
  0xb6   :  { %529 = vmatprep.subr.bf16.mxu1 %v344_v41 }
  0xb7   :  { %530 = vmatpush1.bf16.msra.mxu1 %v343_v42 }
  0xb8   :  { %v153_v47 = vpop.permute.xlu1 %152  ;;  %v151_v48 = vpop.permute.xlu0 %150  ;;  %531 = vmatprep.subr.bf16.mxu1 %v348_v43 }
  0xb9   :  { %v156_v49 = vsel %vm154_vm5, %v149_v39, %v153_v47  ;;  %v158_v6 = vsel %vm154_vm5, %v153_v47, %v149_v39  ;;  %v155_v7 = vsel %vm154_vm5, %v147_v40, %v151_v48  ;;  %v157_v50 = vsel %vm154_vm5, %v151_v48, %v147_v40 }
  0xba   :  { %v169_v51 = vmul.f32 %v162_v44, %v156_v49  ;;  %v170_v52 = vmul.f32 %v166_v45, %v158_v6  ;;  %v167_v53 = vmul.f32 %v162_v44, %v155_v7  ;;  %v168_v54 = vmul.f32 %v166_v45, %v157_v50 }
  0xbb   :  { %532 = vmatpush1.bf16.msra.mxu1 %v347_v46  ;;  %v220_v48 = vrot.slane %v795_v13, %v219_v2  ;;  %v224_v49 = vrot.slane %v803_v15, %v219_v2 }
  0xbc   :  { %v354_v4 = vpop.permute.xlu1 %353  ;;  %v352_v5 = vpop.permute.xlu0 %351  ;;  %v172_v55 = vpack.c.bf16 %v170_v52, %v168_v54  ;;  %v171_v56 = vpack.c.bf16 %v169_v51, %v167_v53 }
  0xbe   :  { %492 = vmatprep.subr.bf16.mxu0 %v172_v55 }
  0xbf   :  { %493 = vmatpush1.bf16.msra.mxu0 %v171_v56 }
  0xc0   :  { %v358_v57 = vpop.permute.xlu1 %357  ;;  %v356_v58 = vpop.permute.xlu0 %355 }
  0xc1   :  { %v360_v60 = vsel %vm154_vm5, %v354_v4, %v358_v57  ;;  %v362_v61 = vsel %vm154_vm5, %v358_v57, %v354_v4  ;;  %v359_v62 = vsel %vm154_vm5, %v352_v5, %v356_v58  ;;  %v361_v63 = vsel %vm154_vm5, %v356_v58, %v352_v5 }
  0xc2   :  { %v365_v8 = vmul.f32 %v360_v60, %v162_v44  ;;  %v366_v11 = vmul.f32 %v362_v61, %v166_v45  ;;  %v363_v14 = vmul.f32 %v359_v62, %v162_v44  ;;  %v364_v16 = vmul.f32 %v361_v63, %v166_v45 }
  0xc3   :  { %v248_v62 = vsub.s32 7, %v776_v9 }
  0xc4   :  { %v178_v17 = vpop.permute.xlu1 %177  ;;  %v176_v18 = vpop.permute.xlu0 %175  ;;  %v368_v19 = vpack.c.bf16 %v366_v11, %v364_v16  ;;  %v367_v20 = vpack.c.bf16 %v365_v8, %v363_v14 }
  0xc6   :  { %533 = vmatprep.subr.bf16.mxu1 %v368_v19 }
  0xc7   :  { %534 = vmatpush1.bf16.msra.mxu1 %v367_v20 }
  0xc8   :  { %v182_v23 = vpop.permute.xlu1 %181  ;;  %v180_v24 = vpop.permute.xlu0 %179 }
  0xc9   :  { %v185_v25 = vsel %vm183_vm6, %v178_v17, %v182_v23  ;;  %v187_v26 = vsel %vm183_vm6, %v182_v23, %v178_v17  ;;  %v184_v27 = vsel %vm183_vm6, %v176_v18, %v180_v24  ;;  %v186_v28 = vsel %vm183_vm6, %v180_v24, %v176_v18 }
  0xca   :  { %v198_v29 = vmul.f32 %v191_v21, %v185_v25  ;;  %v199_v30 = vmul.f32 %v195_v22, %v187_v26  ;;  %v196_v31 = vmul.f32 %v191_v21, %v184_v27  ;;  %v197_v32 = vmul.f32 %v195_v22, %v186_v28 }
  0xcb   :  { %v249_v23 = vrot.slane %v795_v13, %v248_v62  ;;  %v253_v24 = vrot.slane %v803_v15, %v248_v62 }
  0xcc   :  { %v374_v33 = vpop.permute.xlu1 %373  ;;  %v372_v34 = vpop.permute.xlu0 %371  ;;  %v201_v35 = vpack.c.bf16 %v199_v30, %v197_v32  ;;  %v200_v36 = vpack.c.bf16 %v198_v29, %v196_v31 }
  0xce   :  { %494 = vmatprep.subr.bf16.mxu0 %v201_v35 }
  0xcf   :  { %495 = vmatpush1.bf16.msra.mxu0 %v200_v36 }
  0xd0   :  { %v378_v37 = vpop.permute.xlu1 %377  ;;  %v376_v0 = vpop.permute.xlu0 %375 }
  0xd1   :  { %v380_v38 = vsel %vm183_vm6, %v374_v33, %v378_v37  ;;  %v382_v1 = vsel %vm183_vm6, %v378_v37, %v374_v33  ;;  %v379_v3 = vsel %vm183_vm6, %v372_v34, %v376_v0  ;;  %v381_v39 = vsel %vm183_vm6, %v376_v0, %v372_v34 }
  0xd2   :  { %v385_v40 = vmul.f32 %v380_v38, %v191_v21  ;;  %v386_v41 = vmul.f32 %v382_v1, %v195_v22  ;;  %v383_v42 = vmul.f32 %v379_v3, %v191_v21  ;;  %v384_v43 = vmul.f32 %v381_v39, %v195_v22 }
  0xd4   :  { %v207_v44 = vpop.permute.xlu1 %206  ;;  %v205_v45 = vpop.permute.xlu0 %204  ;;  %v388_v46 = vpack.c.bf16 %v386_v41, %v384_v43  ;;  %v387_v47 = vpack.c.bf16 %v385_v40, %v383_v42 }
  0xd6   :  { %535 = vmatprep.subr.bf16.mxu1 %v388_v46 }
  0xd7   :  { %536 = vmatpush1.bf16.msra.mxu1 %v387_v47 }
  0xd8   :  { %v211_v6 = vpop.permute.xlu1 %210  ;;  %v209_v7 = vpop.permute.xlu0 %208 }
  0xd9   :  { %v214_v50 = vsel %vm212_vm7, %v207_v44, %v211_v6  ;;  %v216_v51 = vsel %vm212_vm7, %v211_v6, %v207_v44  ;;  %v213_v52 = vsel %vm212_vm7, %v205_v45, %v209_v7  ;;  %v215_v53 = vsel %vm212_vm7, %v209_v7, %v205_v45 }
  0xda   :  { %v227_v54 = vmul.f32 %v220_v48, %v214_v50  ;;  %v228_v4 = vmul.f32 %v224_v49, %v216_v51  ;;  %v225_v5 = vmul.f32 %v220_v48, %v213_v52  ;;  %v226_v55 = vmul.f32 %v224_v49, %v215_v53 }
  0xdc   :  { %v394_v56 = vpop.permute.xlu1 %393  ;;  %v392_v57 = vpop.permute.xlu0 %391  ;;  %v230_v58 = vpack.c.bf16 %v228_v4, %v226_v55  ;;  %v229_v59 = vpack.c.bf16 %v227_v54, %v225_v5 }
  0xde   :  { %496 = vmatprep.subr.bf16.mxu0 %v230_v58 }
  0xdf   :  { %497 = vmatpush1.bf16.msra.mxu0 %v229_v59 }
  0xe0   :  { %v398_v60 = vpop.permute.xlu1 %397  ;;  %v396_v61 = vpop.permute.xlu0 %395 }
  0xe1   :  { %v400_v63 = vsel %vm212_vm7, %v394_v56, %v398_v60  ;;  %v402_v8 = vsel %vm212_vm7, %v398_v60, %v394_v56  ;;  %v399_v11 = vsel %vm212_vm7, %v392_v57, %v396_v61  ;;  %v401_v14 = vsel %vm212_vm7, %v396_v61, %v392_v57 }
  0xe2   :  { %v405_v16 = vmul.f32 %v400_v63, %v220_v48  ;;  %v406_v17 = vmul.f32 %v402_v8, %v224_v49  ;;  %v403_v18 = vmul.f32 %v399_v11, %v220_v48  ;;  %v404_v19 = vmul.f32 %v401_v14, %v224_v49 }
  0xe4   :  { %v236_v20 = vpop.permute.xlu1 %235  ;;  %v234_v21 = vpop.permute.xlu0 %233  ;;  %v408_v22 = vpack.c.bf16 %v406_v17, %v404_v19  ;;  %v407_v9 = vpack.c.bf16 %v405_v16, %v403_v18 }
  0xe6   :  { %537 = vmatprep.subr.bf16.mxu1 %v408_v22 }
  0xe7   :  { %538 = vmatpush1.bf16.msra.mxu1 %v407_v9 }
  0xe8   :  { %v240_v25 = vpop.permute.xlu1 %239  ;;  %v238_v26 = vpop.permute.xlu0 %237 }
  0xe9   :  { %v243_v27 = vsel %vm241_vm8, %v236_v20, %v240_v25  ;;  %v245_v28 = vsel %vm241_vm8, %v240_v25, %v236_v20  ;;  %v242_v29 = vsel %vm241_vm8, %v234_v21, %v238_v26  ;;  %v244_v30 = vsel %vm241_vm8, %v238_v26, %v234_v21 }
  0xea   :  { %v256_v31 = vmul.f32 %v249_v23, %v243_v27  ;;  %v257_v32 = vmul.f32 %v253_v24, %v245_v28  ;;  %v254_v13 = vmul.f32 %v249_v23, %v242_v29  ;;  %v255_v33 = vmul.f32 %v253_v24, %v244_v30 }
  0xec   :  { %v414_v15 = vpop.permute.xlu1 %413  ;;  %v412_v34 = vpop.permute.xlu0 %411  ;;  %v259_v35 = vpack.c.bf16 %v257_v32, %v255_v33  ;;  %v258_v36 = vpack.c.bf16 %v256_v31, %v254_v13 }
  0xee   :  { %498 = vmatprep.subr.bf16.mxu0 %v259_v35 }
  0xef   :  { %499 = vmatpush1.bf16.msra.mxu0 %v258_v36 }
  0xf0   :  { %v418_v37 = vpop.permute.xlu1 %417  ;;  %v416_v0 = vpop.permute.xlu0 %415 }
  0xf1   :  { %v420_v2 = vsel %vm241_vm8, %v414_v15, %v418_v37  ;;  %v422_v38 = vsel %vm241_vm8, %v418_v37, %v414_v15  ;;  %v419_v1 = vsel %vm241_vm8, %v412_v34, %v416_v0  ;;  %v421_v3 = vsel %vm241_vm8, %v416_v0, %v412_v34 }
  0xf2   :  { %v425_v39 = vmul.f32 %v420_v2, %v249_v23  ;;  %v426_v40 = vmul.f32 %v422_v38, %v253_v24  ;;  %v423_v41 = vmul.f32 %v419_v1, %v249_v23  ;;  %v424_v42 = vmul.f32 %v421_v3, %v253_v24  ;;  %515 = vmatmul.mubr.bf16.vlgmr.msra.gmra.mrb[0].mxu0 %v786_v12 }
  0xf4   :  { %v428_v43 = vpack.c.bf16 %v426_v40, %v424_v42  ;;  %v427_v44 = vpack.c.bf16 %v425_v39, %v423_v41 }
  0xf6   :  { %539 = vmatprep.subr.bf16.mxu1 %v428_v43 }
  0xf7   :  { %540 = vmatpush1.bf16.msra.mxu1 %v427_v44 }
  0xfa   :  { %556 = vmatmul.mubr.bf16.vlgmr.msra.gmra.mrb[0].mxu1 %v786_v12 }
 0x101   :  { %v599_v45 = vpop.permute.xlu1 %598 }
 0x102   :  { %v570_v46 = vpop.permute.xlu0 %569 }
 0x105   :  { %v577_v48 = vpop.permute.xlu1 %576 }
 0x106   :  { %v606_v58 = vpop.permute.xlu0 %605 }
 0x1c5   :  { %v516_v47 = vpop.f32.mrb[0].mxu0 }
 0x1c6   :  { %v572_v49 = vmul.f32 %v570_v46, %v516_v47  ;;  %v518_v6 = vpop.f32.mrb[1].mxu0 }
 0x1c7   :  { %v573_v10 = vmul.f32 %v570_v46, %v518_v6  ;;  %v520_v7 = vpop.f32.mrb[2].mxu0 }
 0x1c8   :  { %v579_v50 = vadd.f32 %v577_v48, %v572_v49  ;;  %v521_v51 = vpop.f32.mrb[3].mxu0 }
 0x1c9   :  { %v580_v52 = vadd.f32 %v577_v48, %v573_v10 }
 0x1ca   :  { %vm581_vm9 = vcmp.ge.f32.partialorder %v579_v50, 0.0  ;;  %v583_v53 = vmul.f32 0.01, %v579_v50 }
 0x1cb   :  { %vm582_vm10 = vcmp.ge.f32.partialorder %v580_v52, 0.0  ;;  %v584_v54 = vmul.f32 0.01, %v580_v52 }
 0x1cc   :  { %v585_v4 = vsel %vm581_vm9, %v579_v50, %v583_v53 }
 0x1cd   :  { %v586_v5 = vsel %vm582_vm10, %v580_v52, %v584_v54  ;;  %v557_v55 = vpop.f32.mrb[0].mxu1 }
 0x1ce   :  { %v589_v56 = vcombine.low %v585_v4, %v586_v5  ;;  %v601_v12 = vmul.f32 %v599_v45, %v557_v55  ;;  %v559_v57 = vpop.f32.mrb[1].mxu1 }
 0x1cf   :  { %v602_v59 = vmul.f32 %v599_v45, %v559_v57  ;;  %v561_v60 = vpop.f32.mrb[2].mxu1 }
 0x1d0   :  { %591 = vst [vmem:[%s1007_s4] sm:$0xff] %v589_v56  ;;  %v608_v61 = vadd.f32 %v606_v58, %v601_v12  ;;  %v562_v62 = vpop.f32.mrb[3].mxu1 }
 0x1d1   :  { %v609_v63 = vadd.f32 %v606_v58, %v602_v59 }
 0x1d2   :  { %vm610_vm11 = vcmp.ge.f32.partialorder %v608_v61, 0.0  ;;  %v612_v8 = vmul.f32 0.01, %v608_v61 }
 0x1d3   :  { %vm611_vm12 = vcmp.ge.f32.partialorder %v609_v63, 0.0  ;;  %v613_v11 = vmul.f32 0.01, %v609_v63 }
 0x1d4   :  { %v614_v14 = vsel %vm610_vm11, %v608_v61, %v612_v8 }
 0x1d5   :  { %v615_v16 = vsel %vm611_vm12, %v609_v63, %v613_v11 }
 0x1d6   :  { %v618_v17 = vcombine.low %v614_v14, %v615_v16 }
 0x1d8   :  { %636 = vst [vmem:[%s1007_s4 + $0x8] sm:$0xff] %v618_v17 }

</bundles_post_ra>
